<compile_context>
chip_gen: v7x
topology: tpu7x:2x2x1
jax: 0.10.0
libtpu: 0.0.40
codegen_flags: <defaults>
</compile_context>

<pallas_src>
import functools

import jax
import jax.numpy as jnp
from jax.experimental import pallas as pl
from jax.experimental.pallas import tpu as pltpu


def _round_up(n, m):
    return ((n + m - 1) // m) * m


# ----------------------------------------------------------------------------
# Kernel: one batch tile, all 4 layers fused.  w_ref: (4, D, D), b_ref: (4,1,D)
# ----------------------------------------------------------------------------
def _actor_kernel(x_ref, w_ref, b_ref, out_ref):
    h = x_ref[...]
    h = jnp.maximum(
        jnp.dot(h, w_ref[0], preferred_element_type=jnp.float32) + b_ref[0], 0.0)
    h = jnp.maximum(
        jnp.dot(h, w_ref[1], preferred_element_type=jnp.float32) + b_ref[1], 0.0)
    h = jnp.maximum(
        jnp.dot(h, w_ref[2], preferred_element_type=jnp.float32) + b_ref[2], 0.0)
    h = jnp.dot(h, w_ref[3], preferred_element_type=jnp.float32) + b_ref[3]
    out_ref[...] = h.astype(out_ref.dtype)


# ----------------------------------------------------------------------------
# One-time packing: PyTorch (out, in) weights -> padded (in, out) stack.
# ----------------------------------------------------------------------------
def pack_actor_params(params, state_dim, action_dim, hidden_dim=64):
    dims = [
        (state_dim, hidden_dim),        # fc1
        (hidden_dim, hidden_dim * 2),   # fc2
        (hidden_dim * 2, hidden_dim),   # fc3
        (hidden_dim, action_dim),       # fc4
    ]
    dpad = _round_up(max(state_dim, hidden_dim, hidden_dim * 2, action_dim), 128)
    w = jnp.zeros((4, dpad, dpad), jnp.float32)
    b = jnp.zeros((4, 1, dpad), jnp.float32)
    for i, (fin, fout) in enumerate(dims):
        w = w.at[i, :fin, :fout].set(params[f"w{i+1}"].T)   # (in, out) layout
        b = b.at[i, 0, :fout].set(params[f"b{i+1}"])
    return w, b


# ----------------------------------------------------------------------------
# Wrapper: pad x, run gridded kernel, slice real (batch, action_dim) out.
# ----------------------------------------------------------------------------
def actor_forward(x, w_packed, b_packed, *, action_dim, block_rows=512):
    batch, state_dim = x.shape
    dpad = w_packed.shape[-1]

    tm = min(block_rows, _round_up(batch, 8))
    batch_pad = _round_up(batch, tm)

    # Zero padding is exact: padded input cols hit zero weight rows, padded
    # output cols get zero weight cols + zero bias, so they stay zero.
    xp = jnp.pad(x.astype(jnp.float32),
                 ((0, batch_pad - batch), (0, dpad - state_dim)))

    out = pl.pallas_call(
        _actor_kernel,
        out_shape=jax.ShapeDtypeStruct((batch_pad, dpad), jnp.float32),
        grid=(batch_pad // tm,),
        in_specs=[
            pl.BlockSpec((tm, dpad), lambda i: (i, 0)),          # x: tiled rows
            pl.BlockSpec((4, dpad, dpad), lambda i: (0, 0, 0)),  # W: resident
            pl.BlockSpec((4, 1, dpad), lambda i: (0, 0, 0)),     # b: resident
        ],
        out_specs=pl.BlockSpec((tm, dpad), lambda i: (i, 0)),
        compiler_params=pltpu.CompilerParams(
            dimension_semantics=("parallel",)),
    )(xp, w_packed, b_packed)

    return out[:batch, :action_dim]


actor_forward_jit = jax.jit(
    actor_forward, static_argnames=("action_dim", "block_rows"))


# ----------------------------------------------------------------------------
# Init (PyTorch-style U(-1/sqrt(fan_in), 1/sqrt(fan_in)), weight shape (out,in))
# ----------------------------------------------------------------------------
def init_actor_params(key, state_dim, action_dim, hidden_dim=64):
    dims = [
        (state_dim, hidden_dim),
        (hidden_dim, hidden_dim * 2),
        (hidden_dim * 2, hidden_dim),
        (hidden_dim, action_dim),
    ]
    params = {}
    for i, (fan_in, fan_out) in enumerate(dims, start=1):
        key, kw, kb = jax.random.split(key, 3)
        bound = 1.0 / jnp.sqrt(jnp.float32(fan_in))
        params[f"w{i}"] = jax.random.uniform(
            kw, (fan_out, fan_in), jnp.float32, -bound, bound)
        params[f"b{i}"] = jax.random.uniform(
            kb, (fan_out,), jnp.float32, -bound, bound)
    return params


def _reference_forward(x, params):
    h = jnp.maximum(x @ params["w1"].T + params["b1"], 0.0)
    h = jnp.maximum(h @ params["w2"].T + params["b2"], 0.0)
    h = jnp.maximum(h @ params["w3"].T + params["b3"], 0.0)
    return h @ params["w4"].T + params["b4"]


if __name__ == "__main__":
    key = jax.random.PRNGKey(0)
    batch, state_dim, action_dim, hidden_dim = 2, 8, 4, 32

    kp, kx = jax.random.split(key)
    params = init_actor_params(kp, state_dim, action_dim, hidden_dim)
    x = jax.random.normal(kx, (batch, state_dim), jnp.float32)

    # Pack once (this is the only place weights are transposed / padded).
    w_packed, b_packed = pack_actor_params(params, state_dim, action_dim, hidden_dim)

    out = actor_forward_jit(x, w_packed, b_packed, action_dim=action_dim)
    out = jax.block_until_ready(out)

    ref = _reference_forward(x, params)
    assert out.shape == (batch, action_dim)
    assert jnp.allclose(out, ref, atol=1e-5, rtol=1e-5), "mismatch vs reference"

    print("KERNEL_OK")
</pallas_src>

<mosaic_0001>
module attributes {stable_mosaic.version = 11 : i64} {
  func.func @_actor_kernel(%arg0: i32, %arg1: memref<8x128xf32, #tpu.memory_space<vmem>>, %arg2: memref<4x128x128xf32, #tpu.memory_space<vmem>>, %arg3: memref<4x1x128xf32, #tpu.memory_space<vmem>>, %arg4: memref<8x128xf32, #tpu.memory_space<vmem>>) attributes {dimension_semantics = [#tpu.dimension_semantics<parallel>], iteration_bounds = array<i64: 1>, scalar_prefetch = 0 : i64, scratch_operands = 0 : i64, tpu.core_type = #tpu.core_type<tc>, window_params = [{transform_indices = @transform_0, window_bounds = array<i64: 8, 128>}, {pipeline_mode = #tpu.pipeline_mode<synchronous>, transform_indices = @transform_1, window_bounds = array<i64: 4, 128, 128>}, {pipeline_mode = #tpu.pipeline_mode<synchronous>, transform_indices = @transform_2, window_bounds = array<i64: 4, 1, 128>}, {transform_indices = @transform_3, window_bounds = array<i64: 8, 128>}]} {
    %c0 = arith.constant 0 : index
    %c0_0 = arith.constant 0 : index
    %0 = vector.load %arg1[%c0, %c0_0] : memref<8x128xf32, #tpu.memory_space<vmem>>, vector<8x128xf32>
    %c0_1 = arith.constant 0 : index
    %c0_2 = arith.constant 0 : index
    %c0_3 = arith.constant 0 : index
    %1 = vector.load %arg2[%c0_1, %c0_2, %c0_3] : memref<4x128x128xf32, #tpu.memory_space<vmem>>, vector<1x128x128xf32>
    %2 = vector.shape_cast %1 : vector<1x128x128xf32> to vector<128x128xf32>
    %cst = arith.constant dense<0.000000e+00> : vector<8x128xf32>
    %3 = tpu.matmul %0, %2, %cst {dimension_numbers = #tpu.dot_dimension_numbers<[1], [0], [0], [1], [0, 0, 1, 1], [], []>} : vector<8x128xf32>, vector<128x128xf32>, vector<8x128xf32> -> vector<8x128xf32>
    %c0_4 = arith.constant 0 : index
    %c0_5 = arith.constant 0 : index
    %c0_6 = arith.constant 0 : index
    %4 = vector.load %arg3[%c0_4, %c0_5, %c0_6] : memref<4x1x128xf32, #tpu.memory_space<vmem>>, vector<1x1x128xf32>
    %5 = vector.shape_cast %4 : vector<1x1x128xf32> to vector<1x128xf32>
    %6 = vector.broadcast %5 : vector<1x128xf32> to vector<8x128xf32>
    %7 = arith.addf %3, %6 : vector<8x128xf32>
    %cst_7 = arith.constant 0.000000e+00 : f32
    %8 = vector.broadcast %cst_7 : f32 to vector<8x128xf32>
    %9 = arith.maximumf %7, %8 : vector<8x128xf32>
    %c1 = arith.constant 1 : index
    %c0_8 = arith.constant 0 : index
    %c0_9 = arith.constant 0 : index
    %10 = vector.load %arg2[%c1, %c0_8, %c0_9] : memref<4x128x128xf32, #tpu.memory_space<vmem>>, vector<1x128x128xf32>
    %11 = vector.shape_cast %10 : vector<1x128x128xf32> to vector<128x128xf32>
    %cst_10 = arith.constant dense<0.000000e+00> : vector<8x128xf32>
    %12 = tpu.matmul %9, %11, %cst_10 {dimension_numbers = #tpu.dot_dimension_numbers<[1], [0], [0], [1], [0, 0, 1, 1], [], []>} : vector<8x128xf32>, vector<128x128xf32>, vector<8x128xf32> -> vector<8x128xf32>
    %c1_11 = arith.constant 1 : index
    %c0_12 = arith.constant 0 : index
    %c0_13 = arith.constant 0 : index
    %13 = vector.load %arg3[%c1_11, %c0_12, %c0_13] : memref<4x1x128xf32, #tpu.memory_space<vmem>>, vector<1x1x128xf32>
    %14 = vector.shape_cast %13 : vector<1x1x128xf32> to vector<1x128xf32>
    %15 = vector.broadcast %14 : vector<1x128xf32> to vector<8x128xf32>
    %16 = arith.addf %12, %15 : vector<8x128xf32>
    %cst_14 = arith.constant 0.000000e+00 : f32
    %17 = vector.broadcast %cst_14 : f32 to vector<8x128xf32>
    %18 = arith.maximumf %16, %17 : vector<8x128xf32>
    %c2 = arith.constant 2 : index
    %c0_15 = arith.constant 0 : index
    %c0_16 = arith.constant 0 : index
    %19 = vector.load %arg2[%c2, %c0_15, %c0_16] : memref<4x128x128xf32, #tpu.memory_space<vmem>>, vector<1x128x128xf32>
    %20 = vector.shape_cast %19 : vector<1x128x128xf32> to vector<128x128xf32>
    %cst_17 = arith.constant dense<0.000000e+00> : vector<8x128xf32>
    %21 = tpu.matmul %18, %20, %cst_17 {dimension_numbers = #tpu.dot_dimension_numbers<[1], [0], [0], [1], [0, 0, 1, 1], [], []>} : vector<8x128xf32>, vector<128x128xf32>, vector<8x128xf32> -> vector<8x128xf32>
    %c2_18 = arith.constant 2 : index
    %c0_19 = arith.constant 0 : index
    %c0_20 = arith.constant 0 : index
    %22 = vector.load %arg3[%c2_18, %c0_19, %c0_20] : memref<4x1x128xf32, #tpu.memory_space<vmem>>, vector<1x1x128xf32>
    %23 = vector.shape_cast %22 : vector<1x1x128xf32> to vector<1x128xf32>
    %24 = vector.broadcast %23 : vector<1x128xf32> to vector<8x128xf32>
    %25 = arith.addf %21, %24 : vector<8x128xf32>
    %cst_21 = arith.constant 0.000000e+00 : f32
    %26 = vector.broadcast %cst_21 : f32 to vector<8x128xf32>
    %27 = arith.maximumf %25, %26 : vector<8x128xf32>
    %c3 = arith.constant 3 : index
    %c0_22 = arith.constant 0 : index
    %c0_23 = arith.constant 0 : index
    %28 = vector.load %arg2[%c3, %c0_22, %c0_23] : memref<4x128x128xf32, #tpu.memory_space<vmem>>, vector<1x128x128xf32>
    %29 = vector.shape_cast %28 : vector<1x128x128xf32> to vector<128x128xf32>
    %cst_24 = arith.constant dense<0.000000e+00> : vector<8x128xf32>
    %30 = tpu.matmul %27, %29, %cst_24 {dimension_numbers = #tpu.dot_dimension_numbers<[1], [0], [0], [1], [0, 0, 1, 1], [], []>} : vector<8x128xf32>, vector<128x128xf32>, vector<8x128xf32> -> vector<8x128xf32>
    %c3_25 = arith.constant 3 : index
    %c0_26 = arith.constant 0 : index
    %c0_27 = arith.constant 0 : index
    %31 = vector.load %arg3[%c3_25, %c0_26, %c0_27] : memref<4x1x128xf32, #tpu.memory_space<vmem>>, vector<1x1x128xf32>
    %32 = vector.shape_cast %31 : vector<1x1x128xf32> to vector<1x128xf32>
    %33 = vector.broadcast %32 : vector<1x128xf32> to vector<8x128xf32>
    %34 = arith.addf %30, %33 : vector<8x128xf32>
    %c0_28 = arith.constant 0 : index
    %c0_29 = arith.constant 0 : index
    %35 = vector.load %arg4[%c0_28, %c0_29] : memref<8x128xf32, #tpu.memory_space<vmem>>, vector<8x128xf32>
    tpu.vector_store %arg4[%c0_28, %c0_29], %34 {strides = array<i32>} : memref<8x128xf32, #tpu.memory_space<vmem>>, vector<8x128xf32>,
    return
  }
  func.func @transform_0(%arg0: i32) -> (i32, i32) {
    %c0_i32 = arith.constant 0 : i32
    %c0_i32_0 = arith.constant 0 : i32
    return %arg0, %c0_i32 : i32, i32
  }
  func.func @transform_1(%arg0: i32) -> (i32, i32, i32) {
    %c0_i32 = arith.constant 0 : i32
    %c0_i32_0 = arith.constant 0 : i32
    %c0_i32_1 = arith.constant 0 : i32
    %c0_i32_2 = arith.constant 0 : i32
    return %c0_i32, %c0_i32_0, %c0_i32_1 : i32, i32, i32
  }
  func.func @transform_2(%arg0: i32) -> (i32, i32, i32) {
    %c0_i32 = arith.constant 0 : i32
    %c0_i32_0 = arith.constant 0 : i32
    %c0_i32_1 = arith.constant 0 : i32
    %c0_i32_2 = arith.constant 0 : i32
    return %c0_i32, %c0_i32_0, %c0_i32_1 : i32, i32, i32
  }
  func.func @transform_3(%arg0: i32) -> (i32, i32) {
    %c0_i32 = arith.constant 0 : i32
    %c0_i32_0 = arith.constant 0 : i32
    return %arg0, %c0_i32 : i32, i32
  }
}

</mosaic_0001>

<bundles_post_ra>
// kernel: actor_forward.1
= control target key start
LH: loop header
LB: loop body
LE: loop exit
PB: predicated region body
PF: predicated region fallthrough
CT: control target
= control target key end

     0   :  { %8 = vsyncpa [#allocation3], 0  ;;  %s757_s12 = smov [#allocation2]   ;;  %s853_s0 = inlined_call_operand.vmem [shape: f32[8,128], index: 0, kind: input, shape index: {}]   ;;  %s854_s1 = inlined_call_operand.hbm [shape: f32[4,128,128], index: 1, kind: input, shape index: {}]   ;;  %s855_s2 = inlined_call_operand.vmem [shape: f32[4,1,128], index: 2, kind: input, shape index: {}]   ;;  %s856_s3 = inlined_call_operand.vmem [shape: f32[8,128], index: 3, kind: output, shape index: {}]  }
   0x1   :  { %s16_s13 = sshll.u32 %s757_s12, 4  ;;  %s733_s16 = scalar_lea.hbm %s854_s1, 8192  ;;  %s17_s13 = int_to_ptr.vmem [resolvable:$true] %s16_s13 }
   0x2   :  { %p734_p0 = scmp.ne.s32.totalorder %s854_s1, %s733_s16  ;;  %p737_p1 = scmp.lt.u32.totalorder %s733_s16, %s854_s1 }
   0x4   :  { %p739_p2 = pnand %p737_p1, %p734_p0 }
   0x6   :  { %742 = shalt.err (!%p739_p2)
}
   0x7   :  { %s743_s21 = scalar_lea.vmem %s17_s13, 8192  ;;  %p748_p4 = scmp.lt.s32.totalorder %s17_s13, %s17_s13 }
   0x8   :  { %p744_p3 = scmp.ne.s32.totalorder %s17_s13, %s743_s21  ;;  %p749_p5 = scmp.lt.s32.totalorder %s743_s21, %s743_s21 }
   0xa   :  { %p750_p6 = por %p749_p5, %p748_p4 }
   0xc   :  { %p751_p7 = pnand %p750_p6, %p744_p3 }
   0xe   :  { %754 = shalt.err (!%p751_p7)
}
   0xf   :  { %s758_s22 = smov 128   ;;  %s759_s23 = smov 8  }
  0x10   :  { %22 = dma.hbm_to_vmem [thread:$0]  %s854_s1, 8192, %s17_s13, [#allocation3], %s758_s22, %s758_s22, %s759_s23  }
  0x11   :  { %755 = dma.done.wait [#allocation3], 8192  }
  0x12   :  { %756 = vsyncadd [#allocation3], 4294959104  ;;  %v760_v0 = vmov 0.0|0.0   ;;  %vm761_vm0 = vmmov 0   ;;  %v762_v1 = vmov 0.0   ;;  %v29_v2 = vld [vmem:[#allocation2] sm:$0xff] }
  0x13   :  { %631 = vmatprep.subr.bf16.mxu0 %v760_v0  ;;  %523 = vmatprep.mubr.msk.f32.mxu0 %vm761_vm0, %v762_v1  ;;  %v30_v3 = vld [vmem:[#allocation2 + $0x8] sm:$0xff]  ;;  %v31_v4 = vld [vmem:[#allocation2 + $0x10] sm:$0xff]  ;;  %v32_v6 = vld [vmem:[#allocation2 + $0x18] sm:$0xff] }
  0x14   :  { %655 = vmatprep.subr.bf16.mxu1 %v760_v0  ;;  %558 = vmatprep.mubr.msk.f32.mxu1 %vm761_vm0, %v762_v1  ;;  %v632_v5 = vpack.c.bf16 %v30_v3, %v29_v2  ;;  %v635_v7 = vpack.c.bf16 %v32_v6, %v31_v4  ;;  %v33_v8 = vld [vmem:[#allocation2 + $0x20] sm:$0xff]  ;;  %v34_v9 = vld [vmem:[#allocation2 + $0x28] sm:$0xff]  ;;  %v126_v12 = vld [vmem:[#allocation2 + $0x90] sm:$0xff] }
  0x15   :  { %v124_v10 = vld [vmem:[#allocation2 + $0x80] sm:$0xff]  ;;  %v125_v11 = vld [vmem:[#allocation2 + $0x88] sm:$0xff]  ;;  %v127_v13 = vld [vmem:[#allocation2 + $0x98] sm:$0xff]  ;;  %v638_v14 = vpack.c.bf16 %v34_v9, %v33_v8 }
  0x16   :  { %633 = vmatpush3.bf16.msra.mxu0 %v632_v5  ;;  %v656_v15 = vpack.c.bf16 %v125_v11, %v124_v10  ;;  %v35_v16 = vld [vmem:[#allocation2 + $0x30] sm:$0xff]  ;;  %v36_v17 = vld [vmem:[#allocation2 + $0x38] sm:$0xff]  ;;  %v659_v18 = vpack.c.bf16 %v127_v13, %v126_v12  ;;  %v128_v19 = vld [vmem:[#allocation2 + $0xa0] sm:$0xff] }
  0x17   :  { %634 = vmatprep.subr.bf16.mxu0 %v760_v0  ;;  %v129_v20 = vld [vmem:[#allocation2 + $0xa8] sm:$0xff]  ;;  %v641_v21 = vpack.c.bf16 %v36_v17, %v35_v16  ;;  %v37_v22 = vld [vmem:[#allocation2 + $0x40] sm:$0xff]  ;;  %v130_v25 = vld [vmem:[#allocation2 + $0xb0] sm:$0xff] }
  0x18   :  { %657 = vmatpush3.bf16.msra.mxu1 %v656_v15  ;;  %v38_v23 = vld [vmem:[#allocation2 + $0x48] sm:$0xff]  ;;  %v662_v24 = vpack.c.bf16 %v129_v20, %v128_v19  ;;  %v131_v26 = vld [vmem:[#allocation2 + $0xb8] sm:$0xff]  ;;  %v39_v28 = vld [vmem:[#allocation2 + $0x50] sm:$0xff] }
  0x19   :  { %658 = vmatprep.subr.bf16.mxu1 %v760_v0  ;;  %v644_v27 = vpack.c.bf16 %v38_v23, %v37_v22  ;;  %v40_v29 = vld [vmem:[#allocation2 + $0x58] sm:$0xff]  ;;  %v665_v30 = vpack.c.bf16 %v131_v26, %v130_v25  ;;  %v132_v31 = vld [vmem:[#allocation2 + $0xc0] sm:$0xff]  ;;  %v133_v32 = vld [vmem:[#allocation2 + $0xc8] sm:$0xff] }
  0x1a   :  { %636 = vmatpush3.bf16.msra.mxu0 %v635_v7  ;;  %v647_v33 = vpack.c.bf16 %v40_v29, %v39_v28  ;;  %v41_v34 = vld [vmem:[#allocation2 + $0x60] sm:$0xff]  ;;  %v42_v35 = vld [vmem:[#allocation2 + $0x68] sm:$0xff]  ;;  %v668_v36 = vpack.c.bf16 %v133_v32, %v132_v31  ;;  %v134_v37 = vld [vmem:[#allocation2 + $0xd0] sm:$0xff] }
  0x1b   :  { %637 = vmatprep.subr.bf16.mxu0 %v760_v0  ;;  %v135_v38 = vld [vmem:[#allocation2 + $0xd8] sm:$0xff]  ;;  %v650_v39 = vpack.c.bf16 %v42_v35, %v41_v34  ;;  %v43_v40 = vld [vmem:[#allocation2 + $0x70] sm:$0xff]  ;;  %v136_v43 = vld [vmem:[#allocation2 + $0xe0] sm:$0xff] }
  0x1c   :  { %660 = vmatpush3.bf16.msra.mxu1 %v659_v18  ;;  %v44_v41 = vld [vmem:[#allocation2 + $0x78] sm:$0xff]  ;;  %v671_v42 = vpack.c.bf16 %v135_v38, %v134_v37  ;;  %v137_v44 = vld [vmem:[#allocation2 + $0xe8] sm:$0xff]  ;;  %v28_v47 = vld [vmem:[%s853_s0] sm:$0xff] }
  0x1d   :  { %661 = vmatprep.subr.bf16.mxu1 %v760_v0  ;;  %v653_v45 = vpack.c.bf16 %v44_v41, %v43_v40  ;;  %v674_v46 = vpack.c.bf16 %v137_v44, %v136_v43  ;;  %v138_v48 = vld [vmem:[#allocation2 + $0xf0] sm:$0xff]  ;;  %v139_v49 = vld [vmem:[#allocation2 + $0xf8] sm:$0xff]  ;;  %v220_v51 = vld [vmem:[#allocation2 + $0x100] sm:$0xff] }
  0x1e   :  { %639 = vmatpush3.bf16.msra.mxu0 %v638_v14  ;;  %v677_v50 = vpack.c.bf16 %v139_v49, %v138_v48  ;;  %v221_v52 = vld [vmem:[#allocation2 + $0x108] sm:$0xff]  ;;  %v222_v53 = vld [vmem:[#allocation2 + $0x110] sm:$0xff]  ;;  %v223_v55 = vld [vmem:[#allocation2 + $0x118] sm:$0xff] }
  0x1f   :  { %640 = vmatprep.subr.bf16.mxu0 %v760_v0  ;;  %v680_v54 = vpack.c.bf16 %v221_v52, %v220_v51  ;;  %v683_v56 = vpack.c.bf16 %v223_v55, %v222_v53  ;;  %v224_v57 = vld [vmem:[#allocation2 + $0x120] sm:$0xff]  ;;  %v225_v58 = vld [vmem:[#allocation2 + $0x128] sm:$0xff]  ;;  %v226_v60 = vld [vmem:[#allocation2 + $0x130] sm:$0xff] }
  0x20   :  { %663 = vmatpush3.bf16.msra.mxu1 %v662_v24  ;;  %v686_v59 = vpack.c.bf16 %v225_v58, %v224_v57  ;;  %v227_v61 = vld [vmem:[#allocation2 + $0x138] sm:$0xff]  ;;  %v228_v63 = vld [vmem:[#allocation2 + $0x140] sm:$0xff]  ;;  %v229_v2 = vld [vmem:[#allocation2 + $0x148] sm:$0xff] }
  0x21   :  { %664 = vmatprep.subr.bf16.mxu1 %v760_v0  ;;  %v689_v62 = vpack.c.bf16 %v227_v61, %v226_v60  ;;  %v692_v3 = vpack.c.bf16 %v229_v2, %v228_v63  ;;  %v230_v4 = vld [vmem:[#allocation2 + $0x150] sm:$0xff]  ;;  %v231_v5 = vld [vmem:[#allocation2 + $0x158] sm:$0xff]  ;;  %v232_v7 = vld [vmem:[#allocation2 + $0x160] sm:$0xff] }
  0x22   :  { %642 = vmatpush3.bf16.msra.mxu0 %v641_v21  ;;  %v695_v6 = vpack.c.bf16 %v231_v5, %v230_v4  ;;  %v233_v8 = vld [vmem:[#allocation2 + $0x168] sm:$0xff]  ;;  %v416_v10 = vld [vmem:[%s855_s2] ss:$0 sm:$0xff]  ;;  %v234_v15 = vld [vmem:[#allocation2 + $0x170] sm:$0xff] }
  0x23   :  { %643 = vmatprep.subr.bf16.mxu0 %v760_v0  ;;  %v698_v9 = vpack.c.bf16 %v233_v8, %v232_v7  ;;  %v235_v16 = vld [vmem:[#allocation2 + $0x178] sm:$0xff]  ;;  %v316_v18 = vld [vmem:[#allocation2 + $0x180] sm:$0xff]  ;;  %v317_v19 = vld [vmem:[#allocation2 + $0x188] sm:$0xff] }
  0x24   :  { %666 = vmatpush3.bf16.msra.mxu1 %v665_v30  ;;  %v701_v17 = vpack.c.bf16 %v235_v16, %v234_v15  ;;  %v318_v20 = vld [vmem:[#allocation2 + $0x190] sm:$0xff]  ;;  %v704_v21 = vpack.c.bf16 %v317_v19, %v316_v18  ;;  %v319_v22 = vld [vmem:[#allocation2 + $0x198] sm:$0xff]  ;;  %v320_v24 = vld [vmem:[#allocation2 + $0x1a0] sm:$0xff] }
  0x25   :  { %667 = vmatprep.subr.bf16.mxu1 %v760_v0  ;;  %v707_v23 = vpack.c.bf16 %v319_v22, %v318_v20  ;;  %v321_v25 = vld [vmem:[#allocation2 + $0x1a8] sm:$0xff]  ;;  %v324_v29 = vld [vmem:[#allocation2 + $0x1c0] sm:$0xff]  ;;  %v326_v32 = vld [vmem:[#allocation2 + $0x1d0] sm:$0xff] }
  0x26   :  { %645 = vmatpush3.bf16.msra.mxu0 %v644_v27  ;;  %v710_v26 = vpack.c.bf16 %v321_v25, %v320_v24  ;;  %v323_v27 = vld [vmem:[#allocation2 + $0x1b8] sm:$0xff]  ;;  %v325_v30 = vld [vmem:[#allocation2 + $0x1c8] sm:$0xff]  ;;  %v328_v35 = vld [vmem:[#allocation2 + $0x1e0] sm:$0xff] }
  0x27   :  { %646 = vmatprep.subr.bf16.mxu0 %v760_v0  ;;  %v716_v31 = vpack.c.bf16 %v325_v30, %v324_v29  ;;  %v418_v38 = vld [vmem:[%s855_s2 + $0x1] ss:$0 sm:$0xff]  ;;  %v330_v43 = vld [vmem:[#allocation2 + $0x1f0] sm:$0xff]  ;;  %v331_v44 = vld [vmem:[#allocation2 + $0x1f8] sm:$0xff] }
  0x28   :  { %669 = vmatpush3.bf16.msra.mxu1 %v668_v36  ;;  %v329_v36 = vld [vmem:[#allocation2 + $0x1e8] sm:$0xff] }
  0x29   :  { %670 = vmatprep.subr.bf16.mxu1 %v760_v0  ;;  %v722_v37 = vpack.c.bf16 %v329_v36, %v328_v35 }
  0x2a   :  { %648 = vmatpush3.bf16.msra.mxu0 %v647_v33  ;;  %v327_v33 = vld [vmem:[#allocation2 + $0x1d8] sm:$0xff] }
  0x2b   :  { %649 = vmatprep.subr.bf16.mxu0 %v760_v0  ;;  %v719_v34 = vpack.c.bf16 %v327_v33, %v326_v32 }
  0x2c   :  { %672 = vmatpush3.bf16.msra.mxu1 %v671_v42 }
  0x2d   :  { %673 = vmatprep.subr.bf16.mxu1 %v760_v0 }
  0x2e   :  { %651 = vmatpush3.bf16.msra.mxu0 %v650_v39 }
  0x2f   :  { %652 = vmatprep.subr.bf16.mxu0 %v760_v0 }
  0x30   :  { %675 = vmatpush3.bf16.msra.mxu1 %v674_v46  ;;  %v420_v46 = vld [vmem:[%s855_s2 + $0x2] ss:$0 sm:$0xff] }
  0x31   :  { %676 = vmatprep.subr.bf16.mxu1 %v760_v0 }
  0x32   :  { %654 = vmatpush3.bf16.msra.mxu0 %v653_v45  ;;  %v725_v45 = vpack.c.bf16 %v331_v44, %v330_v43 }
  0x33   :  { %679 = vmatprep.subr.bf16.mxu0 %v760_v0 }
  0x34   :  { %678 = vmatpush3.bf16.msra.mxu1 %v677_v50  ;;  %v422_v50 = vld [vmem:[%s855_s2 + $0x3] ss:$0 sm:$0xff] }
  0x35   :  { %524 = vmatmul.mubr.f32.vlgmr.msra.gmra.mrb[0].mxu0 %v28_v47  ;;  %703 = vmatprep.subr.bf16.mxu1 %v760_v0 }
  0x36   :  { %593 = vmatprep.mubr.msk.f32.mxu0 %vm761_vm0, %v762_v1  ;;  %681 = vmatpush3.bf16.msra.mxu0 %v680_v54 }
  0x37   :  { %682 = vmatprep.subr.bf16.mxu0 %v760_v0 }
  0x3a   :  { %684 = vmatpush3.bf16.msra.mxu0 %v683_v56 }
  0x3b   :  { %685 = vmatprep.subr.bf16.mxu0 %v760_v0 }
  0x3e   :  { %687 = vmatpush3.bf16.msra.mxu0 %v686_v59 }
  0x3f   :  { %688 = vmatprep.subr.bf16.mxu0 %v760_v0 }
  0x42   :  { %690 = vmatpush3.bf16.msra.mxu0 %v689_v62 }
  0x43   :  { %691 = vmatprep.subr.bf16.mxu0 %v760_v0 }
  0x46   :  { %693 = vmatpush3.bf16.msra.mxu0 %v692_v3 }
  0x47   :  { %694 = vmatprep.subr.bf16.mxu0 %v760_v0 }
  0x4a   :  { %696 = vmatpush3.bf16.msra.mxu0 %v695_v6 }
  0x4b   :  { %697 = vmatprep.subr.bf16.mxu0 %v760_v0 }
  0x4e   :  { %699 = vmatpush3.bf16.msra.mxu0 %v698_v9 }
  0x4f   :  { %700 = vmatprep.subr.bf16.mxu0 %v760_v0 }
  0x52   :  { %702 = vmatpush3.bf16.msra.mxu0 %v701_v17 }
 0x108   :  { %v118_v11 = vpop.f32.mrb[0].mxu0 }
 0x109   :  { %v119_v12 = vadd.f32 %v416_v10, %v118_v11  ;;  %v525_v13 = vpop.f32.mrb[1].mxu0 }
 0x10b   :  { %v122_v14 = vmax.f32 %v119_v12, 0.0 }
 0x10d   :  { %559 = vmatmul.mubr.f32.vlgmr.msra.gmra.mrb[0].mxu1 %v122_v14 }
 0x10e   :  { %628 = vmatprep.mubr.msk.f32.mxu1 %vm761_vm0, %v762_v1  ;;  %705 = vmatpush3.bf16.msra.mxu1 %v704_v21  ;;  %v322_v1 = vld [vmem:[#allocation2 + $0x1b0] sm:$0xff] }
 0x10f   :  { %706 = vmatprep.subr.bf16.mxu1 %v760_v0  ;;  %v713_v28 = vpack.c.bf16 %v323_v27, %v322_v1 }
 0x112   :  { %708 = vmatpush3.bf16.msra.mxu1 %v707_v23 }
 0x113   :  { %709 = vmatprep.subr.bf16.mxu1 %v760_v0 }
 0x116   :  { %711 = vmatpush3.bf16.msra.mxu1 %v710_v26 }
 0x117   :  { %712 = vmatprep.subr.bf16.mxu1 %v760_v0 }
 0x11a   :  { %714 = vmatpush3.bf16.msra.mxu1 %v713_v28 }
 0x11b   :  { %715 = vmatprep.subr.bf16.mxu1 %v760_v0 }
 0x11e   :  { %717 = vmatpush3.bf16.msra.mxu1 %v716_v31 }
 0x11f   :  { %718 = vmatprep.subr.bf16.mxu1 %v760_v0 }
 0x122   :  { %720 = vmatpush3.bf16.msra.mxu1 %v719_v34 }
 0x123   :  { %721 = vmatprep.subr.bf16.mxu1 %v760_v0 }
 0x126   :  { %723 = vmatpush3.bf16.msra.mxu1 %v722_v37 }
 0x127   :  { %724 = vmatprep.subr.bf16.mxu1 %v760_v0 }
 0x12a   :  { %726 = vmatpush3.bf16.msra.mxu1 %v725_v45 }
 0x1e0   :  { %v214_v39 = vpop.f32.mrb[0].mxu1 }
 0x1e1   :  { %v215_v40 = vadd.f32 %v418_v38, %v214_v39  ;;  %v560_v41 = vpop.f32.mrb[1].mxu1 }
 0x1e3   :  { %v218_v42 = vmax.f32 %v215_v40, 0.0 }
 0x1e5   :  { %594 = vmatmul.mubr.f32.vlgmr.msra.gmra.mrb[2].mxu0 %v218_v42 }
 0x2b8   :  { %v310_v47 = vpop.f32.mrb[2].mxu0 }
 0x2b9   :  { %v311_v48 = vadd.f32 %v420_v46, %v310_v47  ;;  %v595_v0 = vpop.f32.mrb[3].mxu0 }
 0x2bb   :  { %v314_v49 = vmax.f32 %v311_v48, 0.0 }
 0x2bd   :  { %629 = vmatmul.mubr.f32.vlgmr.msra.gmra.mrb[2].mxu1 %v314_v49 }
 0x390   :  { %v406_v51 = vpop.f32.mrb[2].mxu1 }
 0x391   :  { %v407_v52 = vadd.f32 %v422_v50, %v406_v51  ;;  %v630_v53 = vpop.f32.mrb[3].mxu1 }
 0x393   :  { %410 = vst [vmem:[%s856_s3] sm:$0xff] %v407_v52 }
 0x394   :  { %415 = vsyncpa [#allocation3], 1 }

</bundles_post_ra>
